<compile_context>
chip_gen: v7x
topology: tpu7x:2x2x1
jax: 0.10.0
libtpu: 0.0.40
codegen_flags: <defaults>
</compile_context>

<pallas_src>
import functools
import math

import jax
import jax.numpy as jnp
from jax.experimental import pallas as pl
from jax.experimental.pallas import tpu as pltpu


def _round_up(x, m):
    return (x + m - 1) // m * m


def _divisors_desc(n):
    return [d for d in range(n, 0, -1) if n % d == 0]


def _choose_tile_h(H, N, Wc, W, Kc, Cout, in_bytes, out_bytes,
                   budget=10 * 1024 * 1024):
    """Largest divisor of H whose double-buffered band working set fits budget."""
    const_bytes = 2 * 3 * Kc * Cout * in_bytes        # resident folded weights
    fitting = []
    for th in _divisors_desc(H):
        if th > 64:
            continue
        vmem = (2 * (th + 2) * Wc * Kc * in_bytes      # input band, 2 buffers
                + 2 * th * W * Cout * out_bytes        # output band, 2 buffers
                + const_bytes)
        if vmem <= budget:
            fitting.append(th)
    if not fitting:
        fitting = [1]
    # Prefer >= 2 grid steps so both TensorCores get work on v7x megacore.
    for th in fitting:
        if N * (H // th) >= 2:
            return th
    return fitting[0]


def _choose_chunk_rows(TH, Wc, target_m=256):
    """Largest divisor of TH with RC*Wc <= target_m (register-resident acc)."""
    best = 1
    for rc in range(1, TH + 1):
        if TH % rc == 0 and rc * Wc <= target_m:
            best = rc
    return best


def _conv_bn_relu_kernel(x_ref, w_ref, b_ref, o_ref, *, TH, W, Wc, RC):
    # x_ref: (1, (TH+2)*Wc, 3*Cin)  kx-folded, zero-padded, flattened H band
    # w_ref: (3, 3*Cin, Cout)       BN-folded conv weights, one slab per ky
    # b_ref: (1, Cout)              BN-folded bias (f32)
    # o_ref: (1, TH, W, Cout)
    Cout = o_ref.shape[-1]
    M = RC * Wc                                   # flattened rows per chunk
    bias = b_ref[...]                             # (1, Cout) f32, hoisted

    def chunk(c, carry):
        r0 = c * RC                               # first output row of chunk
        acc = jnp.zeros((M, Cout), jnp.float32)
        for ky in range(3):                       # unrolled; kx folded into K
            start = pl.multiple_of((r0 + ky) * Wc, 8)   # Wc % 8 == 0 -> aligned
            xs = x_ref[0, pl.ds(start, M), :]     # (M, 3*Cin) contiguous window
            acc = acc + jnp.dot(xs, w_ref[ky],
                                preferred_element_type=jnp.float32)
        acc = jnp.maximum(acc + bias, 0.0)        # bias + ReLU in f32
        out = acc.reshape(RC, Wc, Cout)[:, :W, :]  # drop padded junk columns
        o_ref[0, pl.ds(r0, RC), :, :] = out.astype(o_ref.dtype)
        return carry

    jax.lax.fori_loop(0, TH // RC, chunk, 0, unroll=False)


class ConvBlock:
    """Pallas TPU equivalent of the PyTorch ConvBlock (Conv2d 3x3 + BN + ReLU)."""

    def __init__(self, in_feature, out_feature, *, key=None, eps=1e-5,
                 dtype=jnp.float32):
        self.cin = int(in_feature)
        self.cout = int(out_feature)
        self.eps = eps
        if key is None:
            key = jax.random.PRNGKey(0)
        kw, kb, kg, kbe, km, kv = jax.random.split(key, 6)
        fan_in = self.cin * 9
        bound = 1.0 / math.sqrt(fan_in)
        # Conv2d parameters, PyTorch layout (Cout, Cin, 3, 3).
        self.weight = jax.random.uniform(kw, (self.cout, self.cin, 3, 3),
                                         dtype, -bound, bound)
        self.bias = jax.random.uniform(kb, (self.cout,), dtype, -bound, bound)
        # BatchNorm2d params / running stats (non-trivial so the fold is tested).
        self.gamma = jax.random.uniform(kg, (self.cout,), dtype, 0.5, 1.5)
        self.beta = 0.1 * jax.random.normal(kbe, (self.cout,), dtype)
        self.running_mean = 0.1 * jax.random.normal(km, (self.cout,), dtype)
        self.running_var = jax.random.uniform(kv, (self.cout,), dtype, 0.5, 1.5)

    def _folded_params(self, mxu_dtype):
        # Eval-mode BN fold:  y = (conv(x) + bias - mean) * s + beta,
        #                      s = gamma / sqrt(var + eps)
        scale = (self.gamma / jnp.sqrt(self.running_var + self.eps)).astype(jnp.float32)
        shift = self.beta.astype(jnp.float32) - self.running_mean.astype(jnp.float32) * scale
        # (Cout, Cin, 3, 3) -> (ky, kx, Cin, Cout) -> (ky, kx*Cin + ci, Cout)
        w = jnp.transpose(self.weight.astype(jnp.float32), (2, 3, 1, 0)) * scale
        w = w.reshape(3, 3 * self.cin, self.cout).astype(mxu_dtype)
        b = (self.bias.astype(jnp.float32) * scale + shift).reshape(1, self.cout)
        return w, b

    def __call__(self, x, *, use_bf16_matmul=True):
        # x: (N, Cin, H, W) -- PyTorch NCHW convention.
        N, Cin, H, W = x.shape
        assert Cin == self.cin, (Cin, self.cin)
        Cout = self.cout
        out_dtype = x.dtype
        mxu_dtype = (jnp.bfloat16
                     if (use_bf16_matmul or x.dtype == jnp.bfloat16)
                     else x.dtype)

        Wc = _round_up(W, 8)                  # computed width (sublane-aligned)
        Kc = 3 * Cin                          # kx-folded contraction depth
        in_b = jnp.dtype(mxu_dtype).itemsize
        out_b = jnp.dtype(out_dtype).itemsize
        TH = _choose_tile_h(H, N, Wc, W, Kc, Cout, in_b, out_b)
        RC = _choose_chunk_rows(TH, Wc)
        nb = H // TH
        NB = N * nb
        LB = (TH + 2) * Wc

        # --- host-side layout prep: NCHW->NHWC, pad, kx-fold, H-band gather ---
        x_nhwc = jnp.transpose(x, (0, 2, 3, 1)).astype(mxu_dtype)        # (N,H,W,Cin)
        xp = jnp.pad(x_nhwc, ((0, 0), (1, 1), (1, Wc + 1 - W), (0, 0)))  # (N,H+2,Wc+2,Cin)
        xk = jnp.stack([xp[:, :, kx:kx + Wc, :] for kx in range(3)], axis=3)
        xk = xk.reshape(N, H + 2, Wc, Kc)                                # kx folded into K
        rows = jnp.arange(nb)[:, None] * TH + jnp.arange(TH + 2)[None, :]
        xb = xk[:, rows].reshape(NB, LB, Kc)                             # overlapping bands

        w, b = self._folded_params(mxu_dtype)

        kernel = functools.partial(_conv_bn_relu_kernel, TH=TH, W=W, Wc=Wc, RC=RC)
        flops = 2 * 9 * N * H * Wc * Cin * Cout
        bytes_accessed = (xb.size * jnp.dtype(mxu_dtype).itemsize
                          + w.size * jnp.dtype(mxu_dtype).itemsize
                          + b.size * 4
                          + NB * TH * W * Cout * out_b)

        out = pl.pallas_call(
            kernel,
            out_shape=jax.ShapeDtypeStruct((NB, TH, W, Cout), out_dtype),
            grid_spec=pltpu.PrefetchScalarGridSpec(
                num_scalar_prefetch=0,
                grid=(NB,),
                in_specs=[
                    # one (TH+2)-row band per grid step (double-buffered)
                    pl.BlockSpec((1, LB, Kc), lambda i: (i, 0, 0)),
                    # constant index_map -> folded weights/bias stay VMEM-resident
                    pl.BlockSpec((3, Kc, Cout), lambda i: (0, 0, 0)),
                    pl.BlockSpec((1, Cout), lambda i: (0, 0)),
                ],
                out_specs=pl.BlockSpec((1, TH, W, Cout), lambda i: (i, 0, 0, 0)),
            ),
            compiler_params=pltpu.CompilerParams(
                dimension_semantics=("parallel",)),
            cost_estimate=pl.CostEstimate(flops=flops, transcendentals=0,
                                          bytes_accessed=bytes_accessed),
        )(xb, w, b)

        # (N*nb, TH, W, Cout) -> (N, H, W, Cout) -> NCHW
        out = out.reshape(N, H, W, Cout)
        return jnp.transpose(out, (0, 3, 1, 2))


if __name__ == "__main__":
    key = jax.random.PRNGKey(0)
    N, Cin, Cout, H, W = 2, 4, 8, 16, 16
    k_x, k_p = jax.random.split(key)
    x = jax.random.normal(k_x, (N, Cin, H, W), dtype=jnp.float32)

    module = ConvBlock(Cin, Cout, key=k_p)

    # Pure-JAX reference: conv3x3(pad=1) + bias + eval-mode BatchNorm + ReLU.
    ref = jax.lax.conv_general_dilated(
        x, module.weight, window_strides=(1, 1), padding=((1, 1), (1, 1)),
        dimension_numbers=("NCHW", "OIHW", "NCHW"))
    ref = ref + module.bias.reshape(1, -1, 1, 1)
    scale = module.gamma / jnp.sqrt(module.running_var + module.eps)
    ref = (ref - module.running_mean.reshape(1, -1, 1, 1)) * \
          scale.reshape(1, -1, 1, 1) + module.beta.reshape(1, -1, 1, 1)
    ref = jnp.maximum(ref, 0.0)

    # f32 MXU operands: tight tolerance.
    out_f32 = jax.block_until_ready(module(x, use_bf16_matmul=False))
    assert out_f32.shape == (N, Cout, H, W), out_f32.shape
    err_f32 = jnp.max(jnp.abs(out_f32 - ref))
    assert jnp.allclose(out_f32, ref, atol=5e-4, rtol=5e-4), f"f32 mismatch {err_f32}"

    # Default bf16 MXU operands (per perf review), f32 accumulation: looser tol.
    out_bf16 = jax.block_until_ready(module(x))
    err_bf16 = jnp.max(jnp.abs(out_bf16 - ref))
    assert jnp.allclose(out_bf16, ref, atol=5e-2, rtol=5e-2), f"bf16 mismatch {err_bf16}"

    print("KERNEL_OK")
</pallas_src>

<mosaic_0001>
module attributes {stable_mosaic.version = 11 : i64} {
  func.func @_conv_bn_relu_kernel(%arg0: i32, %arg1: memref<1x288x12xf32, #tpu.memory_space<vmem>>, %arg2: memref<3x12x8xf32, #tpu.memory_space<vmem>>, %arg3: memref<1x8xf32, #tpu.memory_space<vmem>>, %arg4: memref<1x16x16x8xf32, #tpu.memory_space<vmem>>) attributes {dimension_semantics = [#tpu.dimension_semantics<parallel>], iteration_bounds = array<i64: 2>, scalar_prefetch = 0 : i64, scratch_operands = 0 : i64, tpu.core_type = #tpu.core_type<tc>, window_params = [{transform_indices = @transform_0, window_bounds = array<i64: 1, 288, 12>}, {pipeline_mode = #tpu.pipeline_mode<synchronous>, transform_indices = @transform_1, window_bounds = array<i64: 3, 12, 8>}, {pipeline_mode = #tpu.pipeline_mode<synchronous>, transform_indices = @transform_2, window_bounds = array<i64: 1, 8>}, {transform_indices = @transform_3, window_bounds = array<i64: 1, 16, 16, 8>}]} {
    %c0 = arith.constant 0 : index
    %c0_0 = arith.constant 0 : index
    %0 = vector.load %arg3[%c0, %c0_0] : memref<1x8xf32, #tpu.memory_space<vmem>>, vector<1x8xf32>
    %c0_i32 = arith.constant 0 : i32
    %c16_i32 = arith.constant 16 : i32
    %1 = arith.muli %c0_i32, %c16_i32 : i32
    %cst = arith.constant 0.000000e+00 : f32
    %2 = vector.broadcast %cst : f32 to vector<256x8xf32>
    %c0_i32_1 = arith.constant 0 : i32
    %3 = arith.addi %1, %c0_i32_1 : i32
    %c16_i32_2 = arith.constant 16 : i32
    %4 = arith.muli %3, %c16_i32_2 : i32
    %5 = tpu.assume_multiple %4, 8 : i32
    %c0_3 = arith.constant 0 : index
    %6 = arith.index_cast %5 : i32 to index
    %c0_4 = arith.constant 0 : index
    %7 = vector.load %arg1[%c0_3, %6, %c0_4] : memref<1x288x12xf32, #tpu.memory_space<vmem>>, vector<1x256x12xf32>
    %8 = vector.shape_cast %7 : vector<1x256x12xf32> to vector<256x12xf32>
    %c0_5 = arith.constant 0 : index
    %c0_6 = arith.constant 0 : index
    %c0_7 = arith.constant 0 : index
    %9 = vector.load %arg2[%c0_5, %c0_6, %c0_7] : memref<3x12x8xf32, #tpu.memory_space<vmem>>, vector<1x12x8xf32>
    %10 = vector.shape_cast %9 : vector<1x12x8xf32> to vector<12x8xf32>
    %cst_8 = arith.constant dense<0.000000e+00> : vector<256x8xf32>
    %11 = tpu.matmul %8, %10, %cst_8 {dimension_numbers = #tpu.dot_dimension_numbers<[1], [0], [0], [1], [0, 0, 1, 1], [], []>} : vector<256x12xf32>, vector<12x8xf32>, vector<256x8xf32> -> vector<256x8xf32>
    %12 = arith.addf %2, %11 : vector<256x8xf32>
    %c1_i32 = arith.constant 1 : i32
    %13 = arith.addi %1, %c1_i32 : i32
    %c16_i32_9 = arith.constant 16 : i32
    %14 = arith.muli %13, %c16_i32_9 : i32
    %15 = tpu.assume_multiple %14, 8 : i32
    %c0_10 = arith.constant 0 : index
    %16 = arith.index_cast %15 : i32 to index
    %c0_11 = arith.constant 0 : index
    %17 = vector.load %arg1[%c0_10, %16, %c0_11] : memref<1x288x12xf32, #tpu.memory_space<vmem>>, vector<1x256x12xf32>
    %18 = vector.shape_cast %17 : vector<1x256x12xf32> to vector<256x12xf32>
    %c1 = arith.constant 1 : index
    %c0_12 = arith.constant 0 : index
    %c0_13 = arith.constant 0 : index
    %19 = vector.load %arg2[%c1, %c0_12, %c0_13] : memref<3x12x8xf32, #tpu.memory_space<vmem>>, vector<1x12x8xf32>
    %20 = vector.shape_cast %19 : vector<1x12x8xf32> to vector<12x8xf32>
    %cst_14 = arith.constant dense<0.000000e+00> : vector<256x8xf32>
    %21 = tpu.matmul %18, %20, %cst_14 {dimension_numbers = #tpu.dot_dimension_numbers<[1], [0], [0], [1], [0, 0, 1, 1], [], []>} : vector<256x12xf32>, vector<12x8xf32>, vector<256x8xf32> -> vector<256x8xf32>
    %22 = arith.addf %12, %21 : vector<256x8xf32>
    %c2_i32 = arith.constant 2 : i32
    %23 = arith.addi %1, %c2_i32 : i32
    %c16_i32_15 = arith.constant 16 : i32
    %24 = arith.muli %23, %c16_i32_15 : i32
    %25 = tpu.assume_multiple %24, 8 : i32
    %c0_16 = arith.constant 0 : index
    %26 = arith.index_cast %25 : i32 to index
    %c0_17 = arith.constant 0 : index
    %27 = vector.load %arg1[%c0_16, %26, %c0_17] : memref<1x288x12xf32, #tpu.memory_space<vmem>>, vector<1x256x12xf32>
    %28 = vector.shape_cast %27 : vector<1x256x12xf32> to vector<256x12xf32>
    %c2 = arith.constant 2 : index
    %c0_18 = arith.constant 0 : index
    %c0_19 = arith.constant 0 : index
    %29 = vector.load %arg2[%c2, %c0_18, %c0_19] : memref<3x12x8xf32, #tpu.memory_space<vmem>>, vector<1x12x8xf32>
    %30 = vector.shape_cast %29 : vector<1x12x8xf32> to vector<12x8xf32>
    %cst_20 = arith.constant dense<0.000000e+00> : vector<256x8xf32>
    %31 = tpu.matmul %28, %30, %cst_20 {dimension_numbers = #tpu.dot_dimension_numbers<[1], [0], [0], [1], [0, 0, 1, 1], [], []>} : vector<256x12xf32>, vector<12x8xf32>, vector<256x8xf32> -> vector<256x8xf32>
    %32 = arith.addf %22, %31 : vector<256x8xf32>
    %33 = vector.broadcast %0 : vector<1x8xf32> to vector<256x8xf32>
    %34 = arith.addf %32, %33 : vector<256x8xf32>
    %cst_21 = arith.constant 0.000000e+00 : f32
    %35 = vector.broadcast %cst_21 : f32 to vector<256x8xf32>
    %36 = arith.maximumf %34, %35 : vector<256x8xf32>
    %37 = vector.shape_cast %36 : vector<256x8xf32> to vector<16x16x8xf32>
    %c0_22 = arith.constant 0 : index
    %38 = arith.index_cast %1 : i32 to index
    %c0_23 = arith.constant 0 : index
    %c0_24 = arith.constant 0 : index
    %39 = vector.load %arg4[%c0_22, %38, %c0_23, %c0_24] : memref<1x16x16x8xf32, #tpu.memory_space<vmem>>, vector<1x16x16x8xf32>
    %40 = vector.shape_cast %39 : vector<1x16x16x8xf32> to vector<16x16x8xf32>
    %41 = vector.shape_cast %37 : vector<16x16x8xf32> to vector<1x16x16x8xf32>
    tpu.vector_store %arg4[%c0_22, %38, %c0_23, %c0_24], %41 {strides = array<i32>} : memref<1x16x16x8xf32, #tpu.memory_space<vmem>>, vector<1x16x16x8xf32>,
    %c1_i32_25 = arith.constant 1 : i32
    return
  }
  func.func @transform_0(%arg0: i32) -> (i32, i32, i32) {
    %c0_i32 = arith.constant 0 : i32
    %c0_i32_0 = arith.constant 0 : i32
    %c0_i32_1 = arith.constant 0 : i32
    return %arg0, %c0_i32, %c0_i32_0 : i32, i32, i32
  }
  func.func @transform_1(%arg0: i32) -> (i32, i32, i32) {
    %c0_i32 = arith.constant 0 : i32
    %c0_i32_0 = arith.constant 0 : i32
    %c0_i32_1 = arith.constant 0 : i32
    %c0_i32_2 = arith.constant 0 : i32
    return %c0_i32, %c0_i32_0, %c0_i32_1 : i32, i32, i32
  }
  func.func @transform_2(%arg0: i32) -> (i32, i32) {
    %c0_i32 = arith.constant 0 : i32
    %c0_i32_0 = arith.constant 0 : i32
    %c0_i32_1 = arith.constant 0 : i32
    return %c0_i32, %c0_i32_0 : i32, i32
  }
  func.func @transform_3(%arg0: i32) -> (i32, i32, i32, i32) {
    %c0_i32 = arith.constant 0 : i32
    %c0_i32_0 = arith.constant 0 : i32
    %c0_i32_1 = arith.constant 0 : i32
    %c0_i32_2 = arith.constant 0 : i32
    return %arg0, %c0_i32, %c0_i32_0, %c0_i32_1 : i32, i32, i32, i32
  }
}

</mosaic_0001>

<bundles_post_ra>
// kernel: tpu_custom_call.1
= control target key start
LH: loop header
LB: loop body
LE: loop exit
PB: predicated region body
PF: predicated region fallthrough
CT: control target
= control target key end

     0   :  { %s2002_s12 = smov 0   ;;  %s2310_s0 = inlined_call_operand.vmem [shape: f32[2,288,12], index: 0, kind: input, shape index: {}]   ;;  %s2311_s1 = inlined_call_operand.vmem [shape: f32[3,12,8], index: 1, kind: input, shape index: {}]   ;;  %s2312_s2 = inlined_call_operand.vmem [shape: f32[1,8], index: 2, kind: input, shape index: {}]   ;;  %s2313_s3 = inlined_call_operand.vmem [shape: f32[2,16,16,8], index: 3, kind: output, shape index: {}]  }
   0x1 LB: > { %s1442_s13 = sadd.s32 4294967295, %s1979_s12   ;;  %p1446_p0 = scmp.ge.s32.totalorder %s1979_s12, 1  ;;  %s1979_s12 = sphi %s2002_s12, %s13_s12  }
   0x2   : > { %p137_p1 = scmp.lt.s32.totalorder %s1979_s12, 3 }
   0x4   : > { %p138_p2 = pnand %p1446_p0, %p137_p1 }
   0x5   : > { %v1482_v0 = vld [vmem:[%s2311_s1 + $0x10] sm:$0xff] (!%p138_p2)  ;;  %v1483_v1 = vld [vmem:[%s2311_s1 + $0x18] sm:$0xf] (!%p138_p2)  ;;  %vm339_vm0 = vcmask (!%p138_p2), 1043456   ;;  %v204_v2 = vld [vmem:[%s2311_s1] sm:$0xff] (!%p138_p2)  ;;  %vm1981_vm1 = vmmov (!%p138_p2), 1  }
   0x6   : > { %141 = sbr.rel (%p138_p2) target bundleno = 331 (0x14b), region = 32  ;;  %v1879_v3 = vpack.c.bf16 (!%p138_p2), %v1483_v1, %v1482_v0  ;;  %vm2019_vm2 = vmpackc.low (!%p138_p2), %vm339_vm0, %vm1981_vm1  ;;  %v205_v5 = vld [vmem:[%s2311_s1 + $0x8] sm:$0xf] (!%p138_p2)  ;;  %p161_p3 = scmp.lt.s32.totalorder (!%p138_p2), %s1442_s13, 1  ;;  %v1582_v6 = vld [vmem:[%s2311_s1 + $0x20] sm:$0xff] (!%p138_p2)  ;;  %vm242_vm3 = vcmask (!%p138_p2), 97280  }
   0x7   : > { %v1885_v7 = vpack.c.bf16 (!%p138_p2), %v205_v5, %v204_v2  ;;  %v1583_v8 = vld [vmem:[%s2311_s1 + $0x28] sm:$0xf] (!%p138_p2)  ;;  %v2199_v62 = vld [vmem:[%s2312_s2] ss:$0 sm:$0xff] (!%p138_p2)  ;;  %vm1354_vm4 = vcmask (!%p138_p2), 64512  }
   0x8   : > { %1881 = vmatprep.subr.msk.bf16.mxu1 (!%p138_p2), %vm2019_vm2, %v1879_v3  ;;  %v1891_v9 = vpack.c.bf16 (!%p138_p2), %v1583_v8, %v1582_v6 }
   0x9   : > { %1887 = vmatprep.subr.msk.bf16.mxu0 (!%p138_p2), %vm2019_vm2, %v1885_v7  ;;  %1884 = vmatpush3.bf16.msk.msra.mxu1 (!%p138_p2), %vm2019_vm2, %v1879_v3 }
   0xa   : > { %1890 = vmatpush3.bf16.msk.msra.mxu0 (!%p138_p2), %vm2019_vm2, %v1885_v7  ;;  %1897 = vmatprep.subr.msk.bf16.mxu1 (!%p138_p2), %vm2019_vm2, %v1885_v7 }
   0xb   : > { %1893 = vmatprep.subr.msk.bf16.mxu0 (!%p138_p2), %vm2019_vm2, %v1891_v9 }
   0xd   : > { %s2317_s13 = smov (!%p161_p3, %s1442_s13), 1 }
   0xe   : > { %s1963_s26 = smul.u32 288, %s2317_s13  ;;  %s1620_s5 = sshll.u32 %s2317_s13, 8 }
   0xf   : > { %s2206_s8 = scalar_lea.vmem %s2313_s3, %s1620_s5 }
  0x10   : > { %s2050_s29 = scalar_lea.vmem %s2310_s0, %s1963_s26 }
  0x11   : > { %v1450_v10 = vld [vmem:[%s2050_s29 + $0x10] sm:$0xff]  ;;  %v172_v11 = vld [vmem:[%s2050_s29] sm:$0xff]  ;;  %v1451_v12 = vld [vmem:[%s2050_s29 + $0x18] sm:$0xff] }
  0x12   : > { %1727 = vmatprep.mubr.msk.f32.mxu1 %vm242_vm3, %v1450_v10  ;;  %1779 = vmatprep.mubr.msk.f32.mxu0 %vm242_vm3, %v172_v11  ;;  %v173_v13 = vld [vmem:[%s2050_s29 + $0x8] sm:$0xff]  ;;  %v1452_v14 = vld [vmem:[%s2050_s29 + $0x20] sm:$0xff]  ;;  %v1454_v16 = vld [vmem:[%s2050_s29 + $0x30] sm:$0xff] }
  0x13   : > { %1728 = vmatmul.mubr.msk.f32.vlgmr.msra.gmra.mrb[0].mxu1 %vm242_vm3, %v1451_v12  ;;  %1780 = vmatmul.mubr.msk.f32.vlgmr.msra.gmra.mrb[0].mxu0 %vm242_vm3, %v173_v13  ;;  %v1453_v15 = vld [vmem:[%s2050_s29 + $0x28] sm:$0xff]  ;;  %v1455_v17 = vld [vmem:[%s2050_s29 + $0x38] sm:$0xff]  ;;  %v1456_v18 = vld [vmem:[%s2050_s29 + $0x40] sm:$0xff] }
  0x14   : > { %1898 = vmatpush3.bf16.msk.msra.mxu1 %vm2019_vm2, %v1885_v7  ;;  %1896 = vmatpush3.bf16.msk.msra.mxu0 %vm2019_vm2, %v1891_v9  ;;  %v1457_v19 = vld [vmem:[%s2050_s29 + $0x48] sm:$0xff]  ;;  %v1458_v20 = vld [vmem:[%s2050_s29 + $0x50] sm:$0xff]  ;;  %v1459_v21 = vld [vmem:[%s2050_s29 + $0x58] sm:$0xff] }
  0x15   : > { %1730 = vmatprep.mubr.msk.f32.mxu1 %vm242_vm3, %v1452_v14  ;;  %1782 = vmatprep.mubr.msk.f32.mxu0 %vm242_vm3, %v1450_v10  ;;  %v1460_v22 = vld [vmem:[%s2050_s29 + $0x60] sm:$0xff]  ;;  %v1461_v23 = vld [vmem:[%s2050_s29 + $0x68] sm:$0xff]  ;;  %v1462_v24 = vld [vmem:[%s2050_s29 + $0x70] sm:$0xff] }
  0x16   : > { %v1463_v25 = vld [vmem:[%s2050_s29 + $0x78] sm:$0xff]  ;;  %v1464_v26 = vld [vmem:[%s2050_s29 + $0x80] sm:$0xff]  ;;  %v1465_v27 = vld [vmem:[%s2050_s29 + $0x88] sm:$0xff] }
  0x17   : > { %1731 = vmatmul.mubr.msk.f32.gmra.mrb[2].mxu1 %vm242_vm3, %v1453_v15  ;;  %1783 = vmatmul.mubr.msk.f32.gmra.mrb[2].mxu0 %vm242_vm3, %v1451_v12  ;;  %v1466_v28 = vld [vmem:[%s2050_s29 + $0x90] sm:$0xff]  ;;  %v1467_v29 = vld [vmem:[%s2050_s29 + $0x98] sm:$0xff]  ;;  %v1468_v30 = vld [vmem:[%s2050_s29 + $0xa0] sm:$0xff] }
  0x18   : > { %1733 = vmatprep.mubr.msk.f32.mxu1 %vm242_vm3, %v1454_v16  ;;  %1785 = vmatprep.mubr.msk.f32.mxu0 %vm242_vm3, %v1452_v14  ;;  %v1469_v31 = vld [vmem:[%s2050_s29 + $0xa8] sm:$0xff]  ;;  %v1470_v32 = vld [vmem:[%s2050_s29 + $0xb0] sm:$0xff]  ;;  %v1471_v33 = vld [vmem:[%s2050_s29 + $0xb8] sm:$0xff] }
  0x19   : > { %v1472_v34 = vld [vmem:[%s2050_s29 + $0xc0] sm:$0xff]  ;;  %v1473_v35 = vld [vmem:[%s2050_s29 + $0xc8] sm:$0xff]  ;;  %v1474_v36 = vld [vmem:[%s2050_s29 + $0xd0] sm:$0xff] }
  0x1a   : > { %v1475_v37 = vld [vmem:[%s2050_s29 + $0xd8] sm:$0xff]  ;;  %v1476_v38 = vld [vmem:[%s2050_s29 + $0xe0] sm:$0xff]  ;;  %v1477_v39 = vld [vmem:[%s2050_s29 + $0xe8] sm:$0xff] }
  0x1b   : > { %1734 = vmatmul.mubr.msk.f32.gmra.mrb[4].mxu1 %vm242_vm3, %v1455_v17  ;;  %1786 = vmatmul.mubr.msk.f32.gmra.mrb[4].mxu0 %vm242_vm3, %v1453_v15  ;;  %v1478_v40 = vld [vmem:[%s2050_s29 + $0xf0] sm:$0xff]  ;;  %v1479_v41 = vld [vmem:[%s2050_s29 + $0xf8] sm:$0xff]  ;;  %v1480_v42 = vld [vmem:[%s2050_s29 + $0x100] sm:$0xff] }
  0x1c   : > { %1736 = vmatprep.mubr.msk.f32.mxu1 %vm242_vm3, %v1456_v18  ;;  %1788 = vmatprep.mubr.msk.f32.mxu0 %vm242_vm3, %v1454_v16  ;;  %v1481_v43 = vld [vmem:[%s2050_s29 + $0x108] sm:$0xff]  ;;  %v1580_v44 = vld [vmem:[%s2050_s29 + $0x110] sm:$0xff]  ;;  %v1581_v45 = vld [vmem:[%s2050_s29 + $0x118] sm:$0xff] }
  0x1f   : > { %1737 = vmatmul.mubr.msk.f32.gmra.mrb[6].mxu1 %vm242_vm3, %v1457_v19  ;;  %1789 = vmatmul.mubr.msk.f32.gmra.mrb[6].mxu0 %vm242_vm3, %v1455_v17 }
  0x20   : > { %1739 = vmatprep.mubr.msk.f32.mxu1 %vm242_vm3, %v1458_v20  ;;  %1791 = vmatprep.mubr.msk.f32.mxu0 %vm242_vm3, %v1456_v18 }
  0x23   : > { %1740 = vmatmul.mubr.msk.f32.gmra.mrb[8].mxu1 %vm242_vm3, %v1459_v21  ;;  %1792 = vmatmul.mubr.msk.f32.gmra.mrb[8].mxu0 %vm242_vm3, %v1457_v19 }
  0x24   : > { %1742 = vmatprep.mubr.msk.f32.mxu1 %vm242_vm3, %v1460_v22  ;;  %1794 = vmatprep.mubr.msk.f32.mxu0 %vm242_vm3, %v1458_v20 }
  0x27   : > { %1743 = vmatmul.mubr.msk.f32.gmra.mrb[10].mxu1 %vm242_vm3, %v1461_v23  ;;  %1795 = vmatmul.mubr.msk.f32.gmra.mrb[10].mxu0 %vm242_vm3, %v1459_v21 }
  0x28   : > { %1745 = vmatprep.mubr.msk.f32.mxu1 %vm242_vm3, %v1462_v24  ;;  %1797 = vmatprep.mubr.msk.f32.mxu0 %vm242_vm3, %v1460_v22 }
  0x2b   : > { %1746 = vmatmul.mubr.msk.f32.gmra.mrb[12].mxu1 %vm242_vm3, %v1463_v25  ;;  %1798 = vmatmul.mubr.msk.f32.gmra.mrb[12].mxu0 %vm242_vm3, %v1461_v23 }
  0x2c   : > { %1748 = vmatprep.mubr.msk.f32.mxu1 %vm242_vm3, %v1464_v26  ;;  %1800 = vmatprep.mubr.msk.f32.mxu0 %vm242_vm3, %v1462_v24 }
  0x2f   : > { %1749 = vmatmul.mubr.msk.f32.gmra.mrb[14].mxu1 %vm242_vm3, %v1465_v27  ;;  %1801 = vmatmul.mubr.msk.f32.gmra.mrb[14].mxu0 %vm242_vm3, %v1463_v25 }
  0x30   : > { %1751 = vmatprep.mubr.msk.f32.mxu1 %vm242_vm3, %v1466_v28  ;;  %1831 = vmatprep.mubr.msk.f32.mxu0 %vm242_vm3, %v1452_v14 }
  0x33   : > { %1752 = vmatmul.mubr.msk.f32.gmra.mrb[16].mxu1 %vm242_vm3, %v1467_v29  ;;  %1832 = vmatmul.mubr.msk.f32.vlgmr.msra.gmra.mrb[0].mxu0 %vm242_vm3, %v1453_v15 }
  0x34   : > { %1754 = vmatprep.mubr.msk.f32.mxu1 %vm242_vm3, %v1468_v30  ;;  %1834 = vmatprep.mubr.msk.f32.mxu0 %vm242_vm3, %v1454_v16 }
  0x37   : > { %1755 = vmatmul.mubr.msk.f32.gmra.mrb[18].mxu1 %vm242_vm3, %v1469_v31  ;;  %1835 = vmatmul.mubr.msk.f32.gmra.mrb[2].mxu0 %vm242_vm3, %v1455_v17 }
  0x38   : > { %1757 = vmatprep.mubr.msk.f32.mxu1 %vm242_vm3, %v1470_v32  ;;  %1837 = vmatprep.mubr.msk.f32.mxu0 %vm242_vm3, %v1456_v18 }
  0x3b   : > { %1758 = vmatmul.mubr.msk.f32.gmra.mrb[20].mxu1 %vm242_vm3, %v1471_v33  ;;  %1838 = vmatmul.mubr.msk.f32.gmra.mrb[4].mxu0 %vm242_vm3, %v1457_v19 }
  0x3c   : > { %1760 = vmatprep.mubr.msk.f32.mxu1 %vm242_vm3, %v1472_v34  ;;  %1840 = vmatprep.mubr.msk.f32.mxu0 %vm242_vm3, %v1458_v20 }
  0x3f   : > { %1761 = vmatmul.mubr.msk.f32.gmra.mrb[22].mxu1 %vm242_vm3, %v1473_v35  ;;  %1841 = vmatmul.mubr.msk.f32.gmra.mrb[6].mxu0 %vm242_vm3, %v1459_v21 }
  0x40   : > { %1763 = vmatprep.mubr.msk.f32.mxu1 %vm242_vm3, %v1474_v36  ;;  %1843 = vmatprep.mubr.msk.f32.mxu0 %vm242_vm3, %v1460_v22 }
  0x43   : > { %1764 = vmatmul.mubr.msk.f32.gmra.mrb[24].mxu1 %vm242_vm3, %v1475_v37  ;;  %1844 = vmatmul.mubr.msk.f32.gmra.mrb[8].mxu0 %vm242_vm3, %v1461_v23 }
  0x44   : > { %1766 = vmatprep.mubr.msk.f32.mxu1 %vm242_vm3, %v1476_v38  ;;  %1846 = vmatprep.mubr.msk.f32.mxu0 %vm242_vm3, %v1462_v24 }
  0x47   : > { %1767 = vmatmul.mubr.msk.f32.gmra.mrb[26].mxu1 %vm242_vm3, %v1477_v39  ;;  %1847 = vmatmul.mubr.msk.f32.gmra.mrb[10].mxu0 %vm242_vm3, %v1463_v25 }
  0x48   : > { %1769 = vmatprep.mubr.msk.f32.mxu1 %vm242_vm3, %v1478_v40  ;;  %1849 = vmatprep.mubr.msk.f32.mxu0 %vm242_vm3, %v1464_v26 }
  0x4b   : > { %1770 = vmatmul.mubr.msk.f32.gmra.mrb[28].mxu1 %vm242_vm3, %v1479_v41  ;;  %1850 = vmatmul.mubr.msk.f32.gmra.mrb[12].mxu0 %vm242_vm3, %v1465_v27 }
  0x4c   : > { %1772 = vmatprep.mubr.msk.f32.mxu1 %vm242_vm3, %v1480_v42  ;;  %1852 = vmatprep.mubr.msk.f32.mxu0 %vm242_vm3, %v1466_v28 }
  0x4f   : > { %1773 = vmatmul.mubr.msk.f32.gmra.mrb[30].mxu1 %vm242_vm3, %v1481_v43  ;;  %1853 = vmatmul.mubr.msk.f32.gmra.mrb[14].mxu0 %vm242_vm3, %v1467_v29 }
  0x50   : > { %1803 = vmatprep.mubr.msk.f32.mxu1 %vm242_vm3, %v1464_v26  ;;  %1855 = vmatprep.mubr.msk.f32.mxu0 %vm242_vm3, %v1468_v30 }
  0x53   : > { %1804 = vmatmul.mubr.msk.f32.vlgmr.msra.gmra.mrb[16].mxu1 %vm242_vm3, %v1465_v27  ;;  %1856 = vmatmul.mubr.msk.f32.gmra.mrb[16].mxu0 %vm242_vm3, %v1469_v31 }
  0x54   : > { %1806 = vmatprep.mubr.msk.f32.mxu1 %vm242_vm3, %v1466_v28  ;;  %1858 = vmatprep.mubr.msk.f32.mxu0 %vm242_vm3, %v1470_v32 }
  0x57   : > { %1807 = vmatmul.mubr.msk.f32.gmra.mrb[18].mxu1 %vm242_vm3, %v1467_v29  ;;  %1859 = vmatmul.mubr.msk.f32.gmra.mrb[18].mxu0 %vm242_vm3, %v1471_v33 }
  0x58   : > { %1809 = vmatprep.mubr.msk.f32.mxu1 %vm242_vm3, %v1468_v30  ;;  %1861 = vmatprep.mubr.msk.f32.mxu0 %vm242_vm3, %v1472_v34 }
  0x5b   : > { %1810 = vmatmul.mubr.msk.f32.gmra.mrb[20].mxu1 %vm242_vm3, %v1469_v31  ;;  %1862 = vmatmul.mubr.msk.f32.gmra.mrb[20].mxu0 %vm242_vm3, %v1473_v35 }
  0x5c   : > { %1812 = vmatprep.mubr.msk.f32.mxu1 %vm242_vm3, %v1470_v32  ;;  %1864 = vmatprep.mubr.msk.f32.mxu0 %vm242_vm3, %v1474_v36 }
  0x5f   : > { %1813 = vmatmul.mubr.msk.f32.gmra.mrb[22].mxu1 %vm242_vm3, %v1471_v33  ;;  %1865 = vmatmul.mubr.msk.f32.gmra.mrb[22].mxu0 %vm242_vm3, %v1475_v37 }
  0x60   : > { %1815 = vmatprep.mubr.msk.f32.mxu1 %vm242_vm3, %v1472_v34  ;;  %1867 = vmatprep.mubr.msk.f32.mxu0 %vm242_vm3, %v1476_v38 }
  0x63   : > { %1816 = vmatmul.mubr.msk.f32.gmra.mrb[24].mxu1 %vm242_vm3, %v1473_v35  ;;  %1868 = vmatmul.mubr.msk.f32.gmra.mrb[24].mxu0 %vm242_vm3, %v1477_v39 }
  0x64   : > { %1818 = vmatprep.mubr.msk.f32.mxu1 %vm242_vm3, %v1474_v36  ;;  %1870 = vmatprep.mubr.msk.f32.mxu0 %vm242_vm3, %v1478_v40 }
  0x67   : > { %1819 = vmatmul.mubr.msk.f32.gmra.mrb[26].mxu1 %vm242_vm3, %v1475_v37  ;;  %1871 = vmatmul.mubr.msk.f32.gmra.mrb[26].mxu0 %vm242_vm3, %v1479_v41 }
  0x68   : > { %1821 = vmatprep.mubr.msk.f32.mxu1 %vm242_vm3, %v1476_v38  ;;  %1873 = vmatprep.mubr.msk.f32.mxu0 %vm242_vm3, %v1480_v42 }
  0x6b   : > { %1822 = vmatmul.mubr.msk.f32.gmra.mrb[28].mxu1 %vm242_vm3, %v1477_v39  ;;  %1874 = vmatmul.mubr.msk.f32.gmra.mrb[28].mxu0 %vm242_vm3, %v1481_v43 }
  0x6c   : > { %1824 = vmatprep.mubr.msk.f32.mxu1 %vm242_vm3, %v1478_v40  ;;  %1876 = vmatprep.mubr.msk.f32.mxu0 %vm242_vm3, %v1580_v44 }
  0x6f   : > { %1825 = vmatmul.mubr.msk.f32.gmra.mrb[30].mxu1 %vm242_vm3, %v1479_v41  ;;  %1877 = vmatmul.mubr.msk.f32.gmra.mrb[30].mxu0 %vm242_vm3, %v1581_v45 }
  0xe6   : > { %v1729_v46 = vpop.f32.mrb[0].mxu1 }
  0xe7   : > { %v409_v47 = vpop.f32.mrb[1].mxu1 }
  0xea   : > { %v1732_v48 = vpop.f32.mrb[2].mxu1 }
  0xeb   : > { %v419_v49 = vpop.f32.mrb[3].mxu1 }
  0xee   : > { %v1735_v50 = vpop.f32.mrb[4].mxu1 }
  0xef   : > { %v429_v51 = vpop.f32.mrb[5].mxu1 }
  0xf2   : > { %v1738_v52 = vpop.f32.mrb[6].mxu1 }
  0xf3   : > { %v439_v53 = vpop.f32.mrb[7].mxu1 }
  0xf6   : > { %v1741_v54 = vpop.f32.mrb[8].mxu1 }
  0xf7   : > { %v449_v55 = vpop.f32.mrb[9].mxu1 }
  0xfa   : > { %v1744_v56 = vpop.f32.mrb[10].mxu1 }
  0xfb   : > { %v459_v57 = vpop.f32.mrb[11].mxu1 }
  0xfe   : > { %v2188_v58 = vpop.f32.mrb[12].mxu1 }
  0xff   : > { %v2190_v59 = vpop.f32.mrb[13].mxu1 }
 0x102   : > { %v2192_v60 = vpop.f32.mrb[14].mxu1 }
 0x103   : > { %v2194_v61 = vpop.f32.mrb[15].mxu1 }
 0x106   : > { %v1833_v63 = vpop.f32.mrb[0].mxu0 }
 0x107   : > { %v1899_v0 = vadd.f32 %v1833_v63, %v1729_v46  ;;  %v1093_v1 = vpop.f32.mrb[1].mxu0 }
 0x108   : > { %v1900_v2 = vadd.f32 %v1093_v1, %v409_v47 }
 0x109   : > { %v1291_v3 = vadd.f32 %v1899_v0, %v2199_v62 }
 0x10a   : > { %v1290_v4 = vadd.f32 %v1900_v2, %v2199_v62  ;;  %v1836_v5 = vpop.f32.mrb[2].mxu0 }
 0x10b   : > { %v1323_v6 = vmax.f32 %v1291_v3, 0.0  ;;  %v1901_v7 = vadd.f32 %v1836_v5, %v1732_v48  ;;  %v1103_v8 = vpop.f32.mrb[3].mxu0 }
 0x10c   : > { %v1322_v9 = vmax.f32 %v1290_v4, 0.0  ;;  %v1902_v10 = vadd.f32 %v1103_v8, %v419_v49 }
 0x10d   : > { %1356 = vst.msk [vmem:[%s2206_s8 + $0x8] sm:$0xff] %vm1354_vm4, %v1323_v6  ;;  %v1293_v11 = vadd.f32 %v1901_v7, %v2199_v62 }
 0x10e   : > { %1355 = vst.msk [vmem:[%s2206_s8] sm:$0xff] %vm1354_vm4, %v1322_v9  ;;  %v1292_v12 = vadd.f32 %v1902_v10, %v2199_v62  ;;  %v1839_v13 = vpop.f32.mrb[4].mxu0 }
 0x10f   : > { %v1325_v14 = vmax.f32 %v1293_v11, 0.0  ;;  %v1903_v15 = vadd.f32 %v1839_v13, %v1735_v50  ;;  %v1113_v16 = vpop.f32.mrb[5].mxu0 }
 0x110   : > { %v1324_v17 = vmax.f32 %v1292_v12, 0.0  ;;  %v1904_v18 = vadd.f32 %v1113_v16, %v429_v51 }
 0x111   : > { %1358 = vst.msk [vmem:[%s2206_s8 + $0x18] sm:$0xff] %vm1354_vm4, %v1325_v14  ;;  %v1295_v19 = vadd.f32 %v1903_v15, %v2199_v62 }
 0x112   : > { %1357 = vst.msk [vmem:[%s2206_s8 + $0x10] sm:$0xff] %vm1354_vm4, %v1324_v17  ;;  %v1294_v20 = vadd.f32 %v1904_v18, %v2199_v62  ;;  %v1842_v21 = vpop.f32.mrb[6].mxu0 }
 0x113   : > { %v1327_v22 = vmax.f32 %v1295_v19, 0.0  ;;  %v1905_v23 = vadd.f32 %v1842_v21, %v1738_v52  ;;  %v1123_v24 = vpop.f32.mrb[7].mxu0 }
 0x114   : > { %v1326_v25 = vmax.f32 %v1294_v20, 0.0  ;;  %v1906_v26 = vadd.f32 %v1123_v24, %v439_v53 }
 0x115   : > { %1360 = vst.msk [vmem:[%s2206_s8 + $0x28] sm:$0xff] %vm1354_vm4, %v1327_v22  ;;  %v1297_v27 = vadd.f32 %v1905_v23, %v2199_v62 }
 0x116   : > { %1359 = vst.msk [vmem:[%s2206_s8 + $0x20] sm:$0xff] %vm1354_vm4, %v1326_v25  ;;  %v1296_v28 = vadd.f32 %v1906_v26, %v2199_v62  ;;  %v1845_v29 = vpop.f32.mrb[8].mxu0 }
 0x117   : > { %v1329_v30 = vmax.f32 %v1297_v27, 0.0  ;;  %v1907_v31 = vadd.f32 %v1845_v29, %v1741_v54  ;;  %v1133_v32 = vpop.f32.mrb[9].mxu0 }
 0x118   : > { %v1328_v33 = vmax.f32 %v1296_v28, 0.0  ;;  %v1908_v34 = vadd.f32 %v1133_v32, %v449_v55 }
 0x119   : > { %1362 = vst.msk [vmem:[%s2206_s8 + $0x38] sm:$0xff] %vm1354_vm4, %v1329_v30  ;;  %v1299_v35 = vadd.f32 %v1907_v31, %v2199_v62 }
 0x11a   : > { %1361 = vst.msk [vmem:[%s2206_s8 + $0x30] sm:$0xff] %vm1354_vm4, %v1328_v33  ;;  %v1298_v36 = vadd.f32 %v1908_v34, %v2199_v62  ;;  %v1848_v37 = vpop.f32.mrb[10].mxu0 }
 0x11b   : > { %v1331_v38 = vmax.f32 %v1299_v35, 0.0  ;;  %v1909_v39 = vadd.f32 %v1848_v37, %v1744_v56  ;;  %v1143_v40 = vpop.f32.mrb[11].mxu0 }
 0x11c   : > { %v1330_v41 = vmax.f32 %v1298_v36, 0.0  ;;  %v1910_v42 = vadd.f32 %v1143_v40, %v459_v57 }
 0x11d   : > { %1364 = vst.msk [vmem:[%s2206_s8 + $0x48] sm:$0xff] %vm1354_vm4, %v1331_v38  ;;  %v1301_v43 = vadd.f32 %v1909_v39, %v2199_v62 }
 0x11e   : > { %1363 = vst.msk [vmem:[%s2206_s8 + $0x40] sm:$0xff] %vm1354_vm4, %v1330_v41  ;;  %v1300_v44 = vadd.f32 %v1910_v42, %v2199_v62  ;;  %v1851_v45 = vpop.f32.mrb[12].mxu0 }
 0x11f   : > { %v1333_v46 = vmax.f32 %v1301_v43, 0.0  ;;  %v1911_v47 = vadd.f32 %v1851_v45, %v2188_v58  ;;  %v1153_v48 = vpop.f32.mrb[13].mxu0 }
 0x120   : > { %v1332_v49 = vmax.f32 %v1300_v44, 0.0  ;;  %v1912_v50 = vadd.f32 %v1153_v48, %v2190_v59 }
 0x121   : > { %1366 = vst.msk [vmem:[%s2206_s8 + $0x58] sm:$0xff] %vm1354_vm4, %v1333_v46  ;;  %v1303_v51 = vadd.f32 %v1911_v47, %v2199_v62 }
 0x122   : > { %1365 = vst.msk [vmem:[%s2206_s8 + $0x50] sm:$0xff] %vm1354_vm4, %v1332_v49  ;;  %v1302_v52 = vadd.f32 %v1912_v50, %v2199_v62  ;;  %v1854_v53 = vpop.f32.mrb[14].mxu0 }
 0x123   : > { %v1335_v54 = vmax.f32 %v1303_v51, 0.0  ;;  %v1913_v55 = vadd.f32 %v1854_v53, %v2192_v60  ;;  %v1163_v56 = vpop.f32.mrb[15].mxu0 }
 0x124   : > { %v1334_v57 = vmax.f32 %v1302_v52, 0.0  ;;  %v1914_v58 = vadd.f32 %v1163_v56, %v2194_v61 }
 0x125   : > { %1368 = vst.msk [vmem:[%s2206_s8 + $0x68] sm:$0xff] %vm1354_vm4, %v1335_v54  ;;  %v1305_v59 = vadd.f32 %v1913_v55, %v2199_v62 }
 0x126   : > { %1367 = vst.msk [vmem:[%s2206_s8 + $0x60] sm:$0xff] %vm1354_vm4, %v1334_v57  ;;  %v1304_v63 = vadd.f32 %v1914_v58, %v2199_v62  ;;  %v1805_v0 = vpop.f32.mrb[16].mxu1  ;;  %v1857_v1 = vpop.f32.mrb[16].mxu0 }
 0x127   : > { %v1337_v2 = vmax.f32 %v1305_v59, 0.0  ;;  %v1915_v3 = vadd.f32 %v1857_v1, %v1805_v0  ;;  %v813_v4 = vpop.f32.mrb[17].mxu1  ;;  %v1173_v60 = vpop.f32.mrb[17].mxu0 }
 0x128   : > { %v1336_v5 = vmax.f32 %v1304_v63, 0.0  ;;  %v1916_v6 = vadd.f32 %v1173_v60, %v813_v4 }
 0x129   : > { %1370 = vst.msk [vmem:[%s2206_s8 + $0x78] sm:$0xff] %vm1354_vm4, %v1337_v2  ;;  %v1307_v61 = vadd.f32 %v1915_v3, %v2199_v62 }
 0x12a   : > { %1369 = vst.msk [vmem:[%s2206_s8 + $0x70] sm:$0xff] %vm1354_vm4, %v1336_v5  ;;  %v1306_v7 = vadd.f32 %v1916_v6, %v2199_v62  ;;  %v1808_v8 = vpop.f32.mrb[18].mxu1  ;;  %v1860_v9 = vpop.f32.mrb[18].mxu0 }
 0x12b   : > { %v1339_v10 = vmax.f32 %v1307_v61, 0.0  ;;  %v1917_v11 = vadd.f32 %v1860_v9, %v1808_v8  ;;  %v823_v12 = vpop.f32.mrb[19].mxu1  ;;  %v1183_v13 = vpop.f32.mrb[19].mxu0 }
 0x12c   : > { %v1338_v14 = vmax.f32 %v1306_v7, 0.0  ;;  %v1918_v15 = vadd.f32 %v1183_v13, %v823_v12 }
 0x12d   : > { %1372 = vst.msk [vmem:[%s2206_s8 + $0x88] sm:$0xff] %vm1354_vm4, %v1339_v10  ;;  %v1309_v16 = vadd.f32 %v1917_v11, %v2199_v62 }
 0x12e   : > { %1371 = vst.msk [vmem:[%s2206_s8 + $0x80] sm:$0xff] %vm1354_vm4, %v1338_v14  ;;  %v1308_v17 = vadd.f32 %v1918_v15, %v2199_v62  ;;  %v1811_v18 = vpop.f32.mrb[20].mxu1  ;;  %v1863_v19 = vpop.f32.mrb[20].mxu0 }
 0x12f   : > { %v1341_v20 = vmax.f32 %v1309_v16, 0.0  ;;  %v1919_v21 = vadd.f32 %v1863_v19, %v1811_v18  ;;  %v833_v22 = vpop.f32.mrb[21].mxu1  ;;  %v1193_v23 = vpop.f32.mrb[21].mxu0 }
 0x130   : > { %v1340_v24 = vmax.f32 %v1308_v17, 0.0  ;;  %v1920_v25 = vadd.f32 %v1193_v23, %v833_v22 }
 0x131   : > { %1374 = vst.msk [vmem:[%s2206_s8 + $0x98] sm:$0xff] %vm1354_vm4, %v1341_v20  ;;  %v1311_v26 = vadd.f32 %v1919_v21, %v2199_v62 }
 0x132   : > { %1373 = vst.msk [vmem:[%s2206_s8 + $0x90] sm:$0xff] %vm1354_vm4, %v1340_v24  ;;  %v1310_v27 = vadd.f32 %v1920_v25, %v2199_v62  ;;  %v1814_v28 = vpop.f32.mrb[22].mxu1  ;;  %v1866_v29 = vpop.f32.mrb[22].mxu0 }
 0x133   : > { %v1343_v30 = vmax.f32 %v1311_v26, 0.0  ;;  %v1921_v31 = vadd.f32 %v1866_v29, %v1814_v28  ;;  %v843_v32 = vpop.f32.mrb[23].mxu1  ;;  %v1203_v33 = vpop.f32.mrb[23].mxu0 }
 0x134   : > { %v1342_v34 = vmax.f32 %v1310_v27, 0.0  ;;  %v1922_v35 = vadd.f32 %v1203_v33, %v843_v32 }
 0x135   : > { %1376 = vst.msk [vmem:[%s2206_s8 + $0xa8] sm:$0xff] %vm1354_vm4, %v1343_v30  ;;  %v1313_v36 = vadd.f32 %v1921_v31, %v2199_v62 }
 0x136   : > { %1375 = vst.msk [vmem:[%s2206_s8 + $0xa0] sm:$0xff] %vm1354_vm4, %v1342_v34  ;;  %v1312_v37 = vadd.f32 %v1922_v35, %v2199_v62  ;;  %v1817_v38 = vpop.f32.mrb[24].mxu1  ;;  %v1869_v39 = vpop.f32.mrb[24].mxu0 }
 0x137   : > { %v1345_v40 = vmax.f32 %v1313_v36, 0.0  ;;  %v1923_v41 = vadd.f32 %v1869_v39, %v1817_v38  ;;  %v853_v42 = vpop.f32.mrb[25].mxu1  ;;  %v1213_v43 = vpop.f32.mrb[25].mxu0 }
 0x138   : > { %v1344_v44 = vmax.f32 %v1312_v37, 0.0  ;;  %v1924_v45 = vadd.f32 %v1213_v43, %v853_v42 }
 0x139   : > { %1378 = vst.msk [vmem:[%s2206_s8 + $0xb8] sm:$0xff] %vm1354_vm4, %v1345_v40  ;;  %v1315_v46 = vadd.f32 %v1923_v41, %v2199_v62 }
 0x13a   : > { %1377 = vst.msk [vmem:[%s2206_s8 + $0xb0] sm:$0xff] %vm1354_vm4, %v1344_v44  ;;  %v1314_v47 = vadd.f32 %v1924_v45, %v2199_v62  ;;  %v1820_v48 = vpop.f32.mrb[26].mxu1  ;;  %v1872_v49 = vpop.f32.mrb[26].mxu0 }
 0x13b   : > { %v1347_v50 = vmax.f32 %v1315_v46, 0.0  ;;  %v1925_v51 = vadd.f32 %v1872_v49, %v1820_v48  ;;  %v863_v52 = vpop.f32.mrb[27].mxu1  ;;  %v1223_v53 = vpop.f32.mrb[27].mxu0 }
 0x13c   : > { %v1346_v54 = vmax.f32 %v1314_v47, 0.0  ;;  %v1926_v55 = vadd.f32 %v1223_v53, %v863_v52 }
 0x13d   : > { %1380 = vst.msk [vmem:[%s2206_s8 + $0xc8] sm:$0xff] %vm1354_vm4, %v1347_v50  ;;  %v1317_v56 = vadd.f32 %v1925_v51, %v2199_v62 }
 0x13e   : > { %1379 = vst.msk [vmem:[%s2206_s8 + $0xc0] sm:$0xff] %vm1354_vm4, %v1346_v54  ;;  %v1316_v57 = vadd.f32 %v1926_v55, %v2199_v62  ;;  %v1823_v58 = vpop.f32.mrb[28].mxu1  ;;  %v1875_v59 = vpop.f32.mrb[28].mxu0 }
 0x13f   : > { %v1349_v63 = vmax.f32 %v1317_v56, 0.0  ;;  %v1927_v0 = vadd.f32 %v1875_v59, %v1823_v58  ;;  %v873_v1 = vpop.f32.mrb[29].mxu1  ;;  %v1233_v2 = vpop.f32.mrb[29].mxu0 }
 0x140   : > { %v1348_v3 = vmax.f32 %v1316_v57, 0.0  ;;  %v1928_v4 = vadd.f32 %v1233_v2, %v873_v1 }
 0x141   : > { %1382 = vst.msk [vmem:[%s2206_s8 + $0xd8] sm:$0xff] %vm1354_vm4, %v1349_v63  ;;  %v1319_v60 = vadd.f32 %v1927_v0, %v2199_v62 }
 0x142   : > { %1381 = vst.msk [vmem:[%s2206_s8 + $0xd0] sm:$0xff] %vm1354_vm4, %v1348_v3  ;;  %v1318_v5 = vadd.f32 %v1928_v4, %v2199_v62  ;;  %v1826_v6 = vpop.f32.mrb[30].mxu1  ;;  %v1878_v61 = vpop.f32.mrb[30].mxu0 }
 0x143   : > { %v1351_v7 = vmax.f32 %v1319_v60, 0.0  ;;  %v1929_v8 = vadd.f32 %v1878_v61, %v1826_v6  ;;  %v883_v9 = vpop.f32.mrb[31].mxu1  ;;  %v1243_v10 = vpop.f32.mrb[31].mxu0 }
 0x144   : > { %v1350_v11 = vmax.f32 %v1318_v5, 0.0  ;;  %v1930_v12 = vadd.f32 %v1243_v10, %v883_v9 }
 0x145   : > { %1384 = vst.msk [vmem:[%s2206_s8 + $0xe8] sm:$0xff] %vm1354_vm4, %v1351_v7  ;;  %v1321_v13 = vadd.f32 %v1929_v8, %v2199_v62 }
 0x146   : > { %1383 = vst.msk [vmem:[%s2206_s8 + $0xe0] sm:$0xff] %vm1354_vm4, %v1350_v11  ;;  %v1320_v14 = vadd.f32 %v1930_v12, %v2199_v62 }
 0x147   : > { %v1353_v15 = vmax.f32 %v1321_v13, 0.0 }
 0x148   : > { %v1352_v16 = vmax.f32 %v1320_v14, 0.0 }
 0x149   : > { %1386 = vst.msk [vmem:[%s2206_s8 + $0xf8] sm:$0xff] %vm1354_vm4, %v1353_v15 }
 0x14a   : > { %1385 = vst.msk [vmem:[%s2206_s8 + $0xf0] sm:$0xff] %vm1354_vm4, %v1352_v16 }
 0x14b PF: > { %s13_s12 = sadd.s32 1, %s1979_s12  }
 0x14c   : > { %p10_p4 = scmp.ge.s32.totalorder %s13_s12, 4  }
 0x14e   :  { %12 = sbr.rel (!%p10_p4) target bundleno = 1 (0x1), region = 66 }

</bundles_post_ra>
